<compile_context>
chip_gen: v6e
topology: v6e:2x2x1
jax: 0.10.0
libtpu: 0.0.40
codegen_flags: <defaults>
</compile_context>

<pallas_src>
import math

import jax
import jax.numpy as jnp
from jax.experimental import pallas as pl
from jax.experimental.pallas import tpu as pltpu


def _refined_reciprocal(d):
    """EUP approx reciprocal + one Newton step (rel. error ~ eps^2)."""
    r = pl.reciprocal(d, approx=True)
    return r * (2.0 - d * r)


def hloss(x, *, max_tile_rows=512, vmem_limit_bytes=40 * 1024 * 1024):
    """HLoss forward. x: any-rank array with leading batch dim. Returns scalar f32."""
    batch = x.shape[0]
    n = math.prod(x.shape[1:])
    x2 = x.reshape(batch, n)                       # keep native dtype (bf16/f32/...)
    itemsize = jnp.dtype(x2.dtype).itemsize

    # --- tile-size selection: TB rows per grid step, multiple of 8 ---------
    # working set per step ~ double-buffered input (2*itemsize) + ~6 f32 temps
    budget_bytes = 28 * 1024 * 1024
    bytes_per_row = n * (2 * itemsize + 6 * 4)
    tb_budget = (budget_bytes // max(bytes_per_row, 1)) // 8 * 8
    tb_need = ((batch + 7) // 8) * 8               # round batch up to sublane mult.
    tb = max(8, min(max_tile_rows, tb_budget, tb_need))
    num_blocks = pl.cdiv(batch, tb)
    padded_rows = num_blocks * tb

    inv_n = float(1.0 / n)
    inv_nm1 = float(1.0 / max(n - 1, 1))

    def kernel(x_ref, o_ref):
        blk = pl.program_id(0)
        x_t = x_ref[...].astype(jnp.float32)                           # (TB, N)

        # rows past the true batch (ragged last tile) are zeroed out so they
        # contribute nothing and never produce NaN/Inf.
        row_ids = blk * tb + jax.lax.broadcasted_iota(jnp.int32, (tb, 1), 0)
        valid = row_ids < batch                                        # (TB, 1)
        x_t = jnp.where(valid, x_t, 0.0)

        # --- softmax over flattened features ---
        m = jnp.max(x_t, axis=-1, keepdims=True)
        e = jnp.exp(x_t - m)
        denom = jnp.sum(e, axis=-1, keepdims=True)
        sm = e * _refined_reciprocal(denom)                            # (TB, N)

        # --- statistics (torch.var unbiased: /(N-1)) ---
        sum_sm = jnp.sum(sm, axis=-1, keepdims=True)                   # reused below
        mean = sum_sm * inv_n
        d2 = sm - mean
        var = jnp.sum(d2 * d2, axis=-1, keepdims=True) * inv_nm1

        # --- positive-mass soft mask: Softsign(ReLU(sm-mean)/(var+1e-8)*1000) ---
        vplus = var + 1e-8
        scale = _refined_reciprocal(vplus) * 1000.0                    # per-row
        pm = jnp.maximum(d2, 0.0)
        z = pm * scale
        den_ss = 1.0 + jnp.abs(z)
        pos_mask = z * _refined_reciprocal(den_ss)                     # (TB, N)

        # --- masked sums (negative side derived algebraically) ---
        pos_x = jnp.sum(pos_mask * sm, axis=-1, keepdims=True)         # (TB, 1)
        sum_mask = jnp.sum(pos_mask, axis=-1, keepdims=True)
        neg_x = sum_sm - pos_x
        pos_ind = sum_mask * inv_n
        neg_ind = 1.0 - pos_ind

        # --- -sum(softmax(ratio_w) * log_softmax(p)) per row ---
        mp = jnp.maximum(pos_x, neg_x)
        lse = mp + jnp.log(jnp.exp(pos_x - mp) + jnp.exp(neg_x - mp))
        logp_pos = pos_x - lse
        logp_neg = neg_x - lse

        mr = jnp.maximum(pos_ind, neg_ind)
        ep = jnp.exp(pos_ind - mr)
        en = jnp.exp(neg_ind - mr)
        inv_s = _refined_reciprocal(ep + en)
        w_pos = ep * inv_s
        w_neg = en * inv_s

        b_row = -(w_pos * logp_pos + w_neg * logp_neg)                 # (TB, 1)
        o_ref[...] = jnp.where(valid, b_row, 0.0)

    per_row = pl.pallas_call(
        kernel,
        out_shape=jax.ShapeDtypeStruct((padded_rows, 1), jnp.float32),
        grid=(num_blocks,),
        in_specs=[pl.BlockSpec((tb, n), lambda i: (i, 0))],
        out_specs=pl.BlockSpec((tb, 1), lambda i: (i, 0)),
        compiler_params=pltpu.CompilerParams(
            dimension_semantics=("parallel",),
            vmem_limit_bytes=vmem_limit_bytes,
        ),
    )(x2)

    # invalid (padded) rows are exactly zero -> sum / true batch == mean over batch
    return jnp.sum(per_row) / jnp.float32(batch)


def _hloss_ref(x):
    """Pure-JAX reference mirroring the PyTorch forward exactly."""
    b = x.shape[0]
    x = x.reshape(b, -1).astype(jnp.float32)
    x = jax.nn.softmax(x, axis=-1)
    n = x.shape[-1]
    ind = jnp.ones_like(x) / n
    pos_mask = jax.nn.relu(x - jnp.mean(x, axis=-1, keepdims=True))
    var = jnp.var(x, axis=-1, keepdims=True, ddof=1)
    pos_mask = jax.nn.soft_sign(pos_mask / (var + 1e-8) * 1000.0)
    pos_x = jnp.sum(pos_mask * x, axis=-1, keepdims=True)
    neg_x = jnp.sum((1.0 - pos_mask) * x, axis=-1, keepdims=True)
    p = jnp.concatenate([pos_x, neg_x], axis=-1)
    pos_ind = jnp.sum(pos_mask * ind, axis=-1, keepdims=True)
    neg_ind = jnp.sum((1.0 - pos_mask) * ind, axis=-1, keepdims=True)
    ratio_w = jnp.concatenate([pos_ind, neg_ind], axis=-1)
    bb = jax.nn.softmax(ratio_w, axis=-1) * jax.nn.log_softmax(p, axis=-1)
    bb = -1.0 * jnp.sum(bb, axis=-1)
    return jnp.mean(bb)


if __name__ == "__main__":
    key = jax.random.PRNGKey(0)

    # Case 1: module-sized NCHW input (B=2, C=4, H=W=16), f32, single block.
    x = jax.random.normal(key, (2, 4, 16, 16), dtype=jnp.float32)
    out = hloss(x)
    jax.block_until_ready(out)
    ref = _hloss_ref(x)
    assert jnp.allclose(out, ref, rtol=1e-4, atol=1e-6), (out, ref)

    # Case 2: multi-block grid with a ragged last tile (B=18, TB forced to 8).
    k2 = jax.random.PRNGKey(1)
    x2 = jax.random.normal(k2, (18, 4, 16, 16), dtype=jnp.float32)
    out2 = hloss(x2, max_tile_rows=8)
    jax.block_until_ready(out2)
    ref2 = _hloss_ref(x2)
    assert jnp.allclose(out2, ref2, rtol=1e-4, atol=1e-6), (out2, ref2)

    # Case 3: native bf16 input path (no wrapper f32 cast; kernel casts in VMEM).
    x3 = x.astype(jnp.bfloat16)
    out3 = hloss(x3)
    jax.block_until_ready(out3)
    ref3 = _hloss_ref(x3)
    assert jnp.isfinite(out3) and jnp.allclose(out3, ref3, rtol=5e-3, atol=1e-5), (out3, ref3)

    print("KERNEL_OK")
</pallas_src>

<mosaic_0001>
module attributes {stable_mosaic.version = 11 : i64} {
  func.func @kernel(%arg0: i32, %arg1: memref<8x1024xf32, #tpu.memory_space<vmem>>, %arg2: memref<8x1xf32, #tpu.memory_space<vmem>>) attributes {dimension_semantics = [#tpu.dimension_semantics<parallel>], iteration_bounds = array<i64: 1>, scalar_prefetch = 0 : i64, scratch_operands = 0 : i64, tpu.core_type = #tpu.core_type<tc>, window_params = [{transform_indices = @transform_0, window_bounds = array<i64: 8, 1024>}, {transform_indices = @transform_1, window_bounds = array<i64: 8, 1>}]} {
    %c0 = arith.constant 0 : index
    %c0_0 = arith.constant 0 : index
    %0 = vector.load %arg1[%c0, %c0_0] : memref<8x1024xf32, #tpu.memory_space<vmem>>, vector<8x1024xf32>
    %c8_i32 = arith.constant 8 : i32
    %1 = arith.muli %arg0, %c8_i32 : i32
    %2 = tpu.iota {dimensions = array<i32: 0>} : vector<8x1xi32>
    %3 = vector.broadcast %1 : i32 to vector<8x1xi32>
    %4 = arith.addi %3, %2 : vector<8x1xi32>
    %c2_i32 = arith.constant 2 : i32
    %5 = vector.broadcast %c2_i32 : i32 to vector<8x1xi32>
    %6 = arith.cmpi slt, %4, %5 : vector<8x1xi32>
    %cst = arith.constant 0.000000e+00 : f32
    %7 = vector.shape_cast %6 : vector<8x1xi1> to vector<8x1xi1>
    %8 = vector.broadcast %7 : vector<8x1xi1> to vector<8x1024xi1>
    %9 = vector.broadcast %cst : f32 to vector<8x1024xf32>
    %10 = arith.select %8, %0, %9 : vector<8x1024xi1>, vector<8x1024xf32>
    %cst_1 = arith.constant dense<0xFF800000> : vector<8xf32>
    %11 = vector.multi_reduction <maximumf>, %10, %cst_1 [1] : vector<8x1024xf32> to vector<8xf32>
    %12 = vector.shape_cast %11 : vector<8xf32> to vector<8x1xf32>
    %13 = vector.broadcast %12 : vector<8x1xf32> to vector<8x1024xf32>
    %14 = arith.subf %10, %13 : vector<8x1024xf32>
    %15 = math.exp %14 : vector<8x1024xf32>
    %cst_2 = arith.constant dense<0.000000e+00> : vector<8xf32>
    %16 = vector.multi_reduction <add>, %15, %cst_2 [1] : vector<8x1024xf32> to vector<8xf32>
    %17 = vector.shape_cast %16 : vector<8xf32> to vector<8x1xf32>
    %18 = tpu.reciprocal %17 {approx = true} : vector<8x1xf32> -> vector<8x1xf32>
    %19 = arith.mulf %17, %18 : vector<8x1xf32>
    %cst_3 = arith.constant 2.000000e+00 : f32
    %20 = vector.broadcast %cst_3 : f32 to vector<8x1xf32>
    %21 = arith.subf %20, %19 : vector<8x1xf32>
    %22 = arith.mulf %18, %21 : vector<8x1xf32>
    %23 = vector.broadcast %22 : vector<8x1xf32> to vector<8x1024xf32>
    %24 = arith.mulf %15, %23 : vector<8x1024xf32>
    %cst_4 = arith.constant dense<0.000000e+00> : vector<8xf32>
    %25 = vector.multi_reduction <add>, %24, %cst_4 [1] : vector<8x1024xf32> to vector<8xf32>
    %26 = vector.shape_cast %25 : vector<8xf32> to vector<8x1xf32>
    %cst_5 = arith.constant 9.765625E-4 : f32
    %27 = vector.broadcast %cst_5 : f32 to vector<8x1xf32>
    %28 = arith.mulf %26, %27 : vector<8x1xf32>
    %29 = vector.broadcast %28 : vector<8x1xf32> to vector<8x1024xf32>
    %30 = arith.subf %24, %29 : vector<8x1024xf32>
    %31 = arith.mulf %30, %30 : vector<8x1024xf32>
    %cst_6 = arith.constant dense<0.000000e+00> : vector<8xf32>
    %32 = vector.multi_reduction <add>, %31, %cst_6 [1] : vector<8x1024xf32> to vector<8xf32>
    %33 = vector.shape_cast %32 : vector<8xf32> to vector<8x1xf32>
    %cst_7 = arith.constant 9.77517105E-4 : f32
    %34 = vector.broadcast %cst_7 : f32 to vector<8x1xf32>
    %35 = arith.mulf %33, %34 : vector<8x1xf32>
    %cst_8 = arith.constant 9.99999993E-9 : f32
    %36 = vector.broadcast %cst_8 : f32 to vector<8x1xf32>
    %37 = arith.addf %35, %36 : vector<8x1xf32>
    %38 = tpu.reciprocal %37 {approx = true} : vector<8x1xf32> -> vector<8x1xf32>
    %39 = arith.mulf %37, %38 : vector<8x1xf32>
    %cst_9 = arith.constant 2.000000e+00 : f32
    %40 = vector.broadcast %cst_9 : f32 to vector<8x1xf32>
    %41 = arith.subf %40, %39 : vector<8x1xf32>
    %42 = arith.mulf %38, %41 : vector<8x1xf32>
    %cst_10 = arith.constant 1.000000e+03 : f32
    %43 = vector.broadcast %cst_10 : f32 to vector<8x1xf32>
    %44 = arith.mulf %42, %43 : vector<8x1xf32>
    %cst_11 = arith.constant 0.000000e+00 : f32
    %45 = vector.broadcast %cst_11 : f32 to vector<8x1024xf32>
    %46 = arith.maximumf %30, %45 : vector<8x1024xf32>
    %47 = vector.broadcast %44 : vector<8x1xf32> to vector<8x1024xf32>
    %48 = arith.mulf %46, %47 : vector<8x1024xf32>
    %49 = math.absf %48 : vector<8x1024xf32>
    %cst_12 = arith.constant 1.000000e+00 : f32
    %50 = vector.broadcast %cst_12 : f32 to vector<8x1024xf32>
    %51 = arith.addf %50, %49 : vector<8x1024xf32>
    %52 = tpu.reciprocal %51 {approx = true} : vector<8x1024xf32> -> vector<8x1024xf32>
    %53 = arith.mulf %51, %52 : vector<8x1024xf32>
    %cst_13 = arith.constant 2.000000e+00 : f32
    %54 = vector.broadcast %cst_13 : f32 to vector<8x1024xf32>
    %55 = arith.subf %54, %53 : vector<8x1024xf32>
    %56 = arith.mulf %52, %55 : vector<8x1024xf32>
    %57 = arith.mulf %48, %56 : vector<8x1024xf32>
    %58 = arith.mulf %57, %24 : vector<8x1024xf32>
    %cst_14 = arith.constant dense<0.000000e+00> : vector<8xf32>
    %59 = vector.multi_reduction <add>, %58, %cst_14 [1] : vector<8x1024xf32> to vector<8xf32>
    %60 = vector.shape_cast %59 : vector<8xf32> to vector<8x1xf32>
    %cst_15 = arith.constant dense<0.000000e+00> : vector<8xf32>
    %61 = vector.multi_reduction <add>, %57, %cst_15 [1] : vector<8x1024xf32> to vector<8xf32>
    %62 = vector.shape_cast %61 : vector<8xf32> to vector<8x1xf32>
    %63 = arith.subf %26, %60 : vector<8x1xf32>
    %cst_16 = arith.constant 9.765625E-4 : f32
    %64 = vector.broadcast %cst_16 : f32 to vector<8x1xf32>
    %65 = arith.mulf %62, %64 : vector<8x1xf32>
    %cst_17 = arith.constant 1.000000e+00 : f32
    %66 = vector.broadcast %cst_17 : f32 to vector<8x1xf32>
    %67 = arith.subf %66, %65 : vector<8x1xf32>
    %68 = arith.maximumf %60, %63 : vector<8x1xf32>
    %69 = arith.subf %60, %68 : vector<8x1xf32>
    %70 = math.exp %69 : vector<8x1xf32>
    %71 = arith.subf %63, %68 : vector<8x1xf32>
    %72 = math.exp %71 : vector<8x1xf32>
    %73 = arith.addf %70, %72 : vector<8x1xf32>
    %74 = math.log %73 : vector<8x1xf32>
    %75 = arith.addf %68, %74 : vector<8x1xf32>
    %76 = arith.subf %60, %75 : vector<8x1xf32>
    %77 = arith.subf %63, %75 : vector<8x1xf32>
    %78 = arith.maximumf %65, %67 : vector<8x1xf32>
    %79 = arith.subf %65, %78 : vector<8x1xf32>
    %80 = math.exp %79 : vector<8x1xf32>
    %81 = arith.subf %67, %78 : vector<8x1xf32>
    %82 = math.exp %81 : vector<8x1xf32>
    %83 = arith.addf %80, %82 : vector<8x1xf32>
    %84 = tpu.reciprocal %83 {approx = true} : vector<8x1xf32> -> vector<8x1xf32>
    %85 = arith.mulf %83, %84 : vector<8x1xf32>
    %cst_18 = arith.constant 2.000000e+00 : f32
    %86 = vector.broadcast %cst_18 : f32 to vector<8x1xf32>
    %87 = arith.subf %86, %85 : vector<8x1xf32>
    %88 = arith.mulf %84, %87 : vector<8x1xf32>
    %89 = arith.mulf %80, %88 : vector<8x1xf32>
    %90 = arith.mulf %82, %88 : vector<8x1xf32>
    %91 = arith.mulf %89, %76 : vector<8x1xf32>
    %92 = arith.mulf %90, %77 : vector<8x1xf32>
    %93 = arith.addf %91, %92 : vector<8x1xf32>
    %cst_19 = arith.constant 0.000000e+00 : f32
    %94 = vector.broadcast %cst_19 : f32 to vector<8x1xf32>
    %95 = arith.subf %94, %93 : vector<8x1xf32>
    %cst_20 = arith.constant 0.000000e+00 : f32
    %96 = vector.broadcast %cst_20 : f32 to vector<8x1xf32>
    %97 = arith.select %6, %95, %96 : vector<8x1xi1>, vector<8x1xf32>
    %c0_21 = arith.constant 0 : index
    %c0_22 = arith.constant 0 : index
    %98 = vector.load %arg2[%c0_21, %c0_22] : memref<8x1xf32, #tpu.memory_space<vmem>>, vector<8x1xf32>
    tpu.vector_store %arg2[%c0_21, %c0_22], %97 {strides = array<i32>} : memref<8x1xf32, #tpu.memory_space<vmem>>, vector<8x1xf32>,
    return
  }
  func.func @transform_0(%arg0: i32) -> (i32, i32) {
    %c0_i32 = arith.constant 0 : i32
    %c0_i32_0 = arith.constant 0 : i32
    return %arg0, %c0_i32 : i32, i32
  }
  func.func @transform_1(%arg0: i32) -> (i32, i32) {
    %c0_i32 = arith.constant 0 : i32
    %c0_i32_0 = arith.constant 0 : i32
    return %arg0, %c0_i32 : i32, i32
  }
}

</mosaic_0001>

<bundles_post_ra>
// kernel: tpu_custom_call.1
= control target key start
LH: loop header
LB: loop body
LE: loop exit
PB: predicated region body
PF: predicated region fallthrough
CT: control target
= control target key end

     0   :  { %6 = vsyncpa [#allocation3], 0  ;;  %s562_s0 = inlined_call_operand.hbm [shape: f32[2,1024], index: 0, kind: input, shape index: {}]   ;;  %s563_s1 = inlined_call_operand.vmem [shape: f32[8,1], index: 1, kind: output, shape index: {}]  }
   0x1   :  { %11 = vsyncadd [#allocation3], 768  ;;  %s456_s6 = smov [#allocation2]  }
   0x2   :  { %s12_s7 = sshll.u32 %s456_s6, 4  ;;  %s13_s7 = int_to_ptr.vmem [resolvable:$true] %s12_s7 }
   0x3   :  { %s442_s8 = scalar_lea.vmem %s13_s7, 256  ;;  %s446_s9 = scalar_lea.vmem %s13_s7, 1024 }
   0x4   :  { %p443_p0 = scmp.ne.s32.totalorder %s13_s7, %s442_s8  ;;  %p447_p1 = scmp.lt.s32.totalorder %s13_s7, %s13_s7 }
   0x5   :  { %p448_p2 = scmp.lt.s32.totalorder %s446_s9, %s442_s8 }
   0x7   :  { %p449_p3 = por %p448_p2, %p447_p1 }
   0x9   :  { %p450_p4 = pnand %p449_p3, %p443_p0 }
   0xb   :  { %453 = shalt.err (!%p450_p4)
}
   0xc   :  { %s457_s10 = smov 256   ;;  %s458_s11 = smov 16  }
   0xd   :  { %18 = dma.hbm_to_vmem [thread:$0]  %s562_s0, 256, %s13_s7, [#allocation3], %s457_s10, %s457_s10, %s458_s11  }
   0xe   :  { %454 = dma.done.wait [#allocation3], 1024  }
   0xf   :  { %455 = vsyncadd [#allocation3], 4294966272  ;;  %v31_v0 = vlaneseq  ;;  %v459_v1 = vmov 1983009808   ;;  %v374_v6 = vld [vmem:[#allocation2] ss:$16 sps:$4 sm:$0xff]  }
  0x10   :  { %v51_v2 = vunpack.c.l.s4 %v459_v1  ;;  %v376_v7 = vld [vmem:[#allocation2 + $0x4] ss:$16 sps:$4 sm:$0xff]   ;;  %v377_v8 = vld [vmem:[#allocation2 + $0x20] ss:$16 sps:$4 sm:$0xff]   ;;  %v380_v11 = vld [vmem:[#allocation2 + $0x8] ss:$16 sps:$4 sm:$0xff]  }
  0x11   :  { %v473_v3 = vshrl.u32 %v31_v0, 7  ;;  %v379_v9 = vld [vmem:[#allocation2 + $0x24] ss:$16 sps:$4 sm:$0xff]   ;;  %v382_v12 = vld [vmem:[#allocation2 + $0xc] ss:$16 sps:$4 sm:$0xff]   ;;  %vm363_vm1 = vcmask 7168  }
  0x12   :  { %v52_v4 = vunpack.c.0.s8 %v51_v2  ;;  %v383_v13 = vld [vmem:[#allocation2 + $0x28] ss:$16 sps:$4 sm:$0xff]   ;;  %v385_v17 = vld [vmem:[#allocation2 + $0x2c] ss:$16 sps:$4 sm:$0xff]  }
  0x13   :  { %vm35_vm0 = vcmp.lt.s32.totalorder %v473_v3, 2 }
  0x14   :  { %v55_v5 = vsub.s32 %v52_v4, %v473_v3 }
  0x16   :  { %v56_v10 = vrot.slane %v374_v6, %v55_v5  ;;  %v63_v14 = vrot.slane %v376_v7, %v55_v5  ;;  %v70_v15 = vrot.slane %v377_v8, %v55_v5  ;;  %v77_v16 = vrot.slane %v379_v9, %v55_v5 }
  0x17   :  { %v92_v18 = vrot.slane %v380_v11, %v55_v5  ;;  %v99_v19 = vrot.slane %v382_v12, %v55_v5  ;;  %v106_v20 = vrot.slane %v383_v13, %v55_v5  ;;  %v113_v25 = vrot.slane %v385_v17, %v55_v5 }
  0x18   :  { %v78_v21 = vcombine.low %v56_v10, %v70_v15  ;;  %v79_v22 = vcombine.high %v56_v10, %v70_v15  ;;  %v80_v23 = vcombine.low %v63_v14, %v77_v16  ;;  %v81_v24 = vcombine.high %v63_v14, %v77_v16 }
  0x19   :  { %v114_v26 = vcombine.low %v92_v18, %v106_v20  ;;  %v115_v27 = vcombine.high %v92_v18, %v106_v20  ;;  %v116_v32 = vcombine.low %v99_v19, %v113_v25  ;;  %v117_v33 = vcombine.high %v99_v19, %v113_v25 }
  0x1a   :  { %v126_v28 = vsel %vm35_vm0, %v78_v21, 0.0  ;;  %v127_v29 = vsel %vm35_vm0, %v79_v22, 0.0  ;;  %v128_v30 = vsel %vm35_vm0, %v80_v23, 0.0  ;;  %v129_v31 = vsel %vm35_vm0, %v81_v24, 0.0 }
  0x1b   :  { %v130_v34 = vsel %vm35_vm0, %v114_v26, 0.0  ;;  %v131_v35 = vsel %vm35_vm0, %v115_v27, 0.0  ;;  %v132_v38 = vsel %vm35_vm0, %v116_v32, 0.0  ;;  %v133_v39 = vsel %vm35_vm0, %v117_v33, 0.0 }
  0x1c   :  { %v134_v36 = vmax.f32 %v126_v28, %v130_v34  ;;  %v135_v37 = vmax.f32 %v127_v29, %v131_v35  ;;  %v136_v40 = vmax.f32 %v128_v30, %v132_v38  ;;  %v137_v41 = vmax.f32 %v129_v31, %v133_v39 }
  0x1e   :  { %v138_v42 = vmax.f32 %v134_v36, %v135_v37  ;;  %v139_v43 = vmax.f32 %v136_v40, %v137_v41 }
  0x20   :  { %v140_v44 = vmax.f32 %v138_v42, %v139_v43 }
  0x22   :  { %141 = vmax.xlane.f32.xlu0 %v140_v44 }
  0xab   :  { %v142_v45 = vpop.xlane.xlu0 %141 }
  0xac   :  { %v143_v46 = vsub.f32 %v126_v28, %v142_v45  ;;  %v144_v47 = vsub.f32 %v127_v29, %v142_v45  ;;  %v145_v48 = vsub.f32 %v128_v30, %v142_v45  ;;  %v146_v49 = vsub.f32 %v129_v31, %v142_v45 }
  0xad   :  { %v147_v52 = vsub.f32 %v130_v34, %v142_v45  ;;  %v148_v54 = vsub.f32 %v131_v35, %v142_v45  ;;  %v149_v57 = vsub.f32 %v132_v38, %v142_v45  ;;  %v150_v58 = vsub.f32 %v133_v39, %v142_v45 }
  0xae   :  { %v151_v50 = vmul.f32 1.442695, %v143_v46  ;;  %v153_v51 = vmul.f32 1.442695, %v144_v47  ;;  %v155_v53 = vmul.f32 1.442695, %v145_v48 }
  0xaf   :  { %v157_v55 = vmul.f32 1.442695, %v146_v49  ;;  %v159_v56 = vmul.f32 1.442695, %v147_v52  ;;  %v161_v59 = vmul.f32 1.442695, %v148_v54 }
  0xb0   :  { %386 = vpow2.f32 %v151_v50  ;;  %v163_v60 = vmul.f32 1.442695, %v149_v57  ;;  %v165_v61 = vmul.f32 1.442695, %v150_v58 }
  0xb1   :  { %388 = vpow2.f32 %v153_v51 }
  0xb2   :  { %390 = vpow2.f32 %v155_v53 }
  0xb3   :  { %392 = vpow2.f32 %v157_v55 }
  0xb4   :  { %394 = vpow2.f32 %v159_v56 }
  0xb5   :  { %396 = vpow2.f32 %v161_v59 }
  0xb6   :  { %398 = vpow2.f32 %v163_v60 }
  0xb7   :  { %400 = vpow2.f32 %v165_v61 }
  0xbd   :  { %v387_v62 = vpop.eup %386 }
  0xbe   :  { %v389_v63 = vpop.eup %388 }
  0xbf   :  { %v167_v0 = vadd.f32 %v389_v63, %v387_v62  ;;  %v391_v1 = vpop.eup %390 }
  0xc0   :  { %v393_v4 = vpop.eup %392 }
  0xc1   :  { %v168_v2 = vadd.f32 %v391_v1, %v167_v0  ;;  %v395_v6 = vpop.eup %394 }
  0xc2   :  { %v397_v8 = vpop.eup %396 }
  0xc3   :  { %v169_v5 = vadd.f32 %v393_v4, %v168_v2  ;;  %v399_v10 = vpop.eup %398 }
  0xc4   :  { %v401_v12 = vpop.eup %400 }
  0xc5   :  { %v170_v7 = vadd.f32 %v395_v6, %v169_v5 }
  0xc7   :  { %v171_v9 = vadd.f32 %v397_v8, %v170_v7 }
  0xc9   :  { %v172_v11 = vadd.f32 %v399_v10, %v171_v9 }
  0xcb   :  { %v173_v13 = vadd.f32 %v401_v12, %v172_v11 }
  0xcd   :  { %174 = vadd.xlane.f32.xlu0 %v173_v13 }
 0x156   :  { %v175_v14 = vpop.xlane.xlu0 %174 }
 0x157   :  { %402 = vrcp.f32 %v175_v14 }
 0x164   :  { %v403_v15 = vpop.eup %402 }
 0x165   :  { %v177_v16 = vmul.f32 %v403_v15, %v175_v14 }
 0x167   :  { %v178_v17 = vsub.f32 2.0, %v177_v16 }
 0x169   :  { %v179_v18 = vmul.f32 %v403_v15, %v178_v17 }
 0x16b   :  { %v493_v19 = vmul.f32 %v387_v62, %v179_v18  ;;  %v495_v20 = vmul.f32 %v389_v63, %v179_v18  ;;  %v497_v21 = vmul.f32 %v391_v1, %v179_v18  ;;  %v501_v23 = vmul.f32 %v393_v4, %v179_v18 }
 0x16c   :  { %v504_v25 = vmul.f32 %v395_v6, %v179_v18  ;;  %v507_v27 = vmul.f32 %v397_v8, %v179_v18  ;;  %v510_v29 = vmul.f32 %v399_v10, %v179_v18  ;;  %v513_v31 = vmul.f32 %v401_v12, %v179_v18 }
 0x16d   :  { %v188_v22 = vadd.f32 %v495_v20, %v493_v19 }
 0x16f   :  { %v189_v24 = vadd.f32 %v188_v22, %v497_v21 }
 0x171   :  { %v190_v26 = vadd.f32 %v189_v24, %v501_v23 }
 0x173   :  { %v191_v28 = vadd.f32 %v190_v26, %v504_v25 }
 0x175   :  { %v192_v30 = vadd.f32 %v191_v28, %v507_v27 }
 0x177   :  { %v193_v32 = vadd.f32 %v192_v30, %v510_v29 }
 0x179   :  { %v194_v33 = vadd.f32 %v193_v32, %v513_v31 }
 0x17b   :  { %195 = vadd.xlane.f32.xlu1 %v194_v33 }
 0x204   :  { %v517_v34 = vpop.xlane.xlu1 %195 }
 0x205   :  { %v197_v35 = vmul.f32 0.0009765625, %v517_v34 }
 0x207   :  { %v198_v36 = vsub.f32 %v493_v19, %v197_v35  ;;  %v199_v37 = vsub.f32 %v495_v20, %v197_v35  ;;  %v200_v38 = vsub.f32 %v497_v21, %v197_v35  ;;  %v201_v39 = vsub.f32 %v501_v23, %v197_v35 }
 0x208   :  { %v202_v42 = vsub.f32 %v504_v25, %v197_v35  ;;  %v203_v45 = vsub.f32 %v507_v27, %v197_v35  ;;  %v204_v48 = vsub.f32 %v510_v29, %v197_v35  ;;  %v205_v51 = vsub.f32 %v513_v31, %v197_v35 }
 0x209   :  { %v206_v40 = vmul.f32 %v198_v36, %v198_v36  ;;  %v207_v41 = vmul.f32 %v199_v37, %v199_v37  ;;  %v208_v43 = vmul.f32 %v200_v38, %v200_v38  ;;  %v209_v46 = vmul.f32 %v201_v39, %v201_v39 }
 0x20a   :  { %v210_v49 = vmul.f32 %v202_v42, %v202_v42  ;;  %v211_v52 = vmul.f32 %v203_v45, %v203_v45  ;;  %v212_v54 = vmul.f32 %v204_v48, %v204_v48  ;;  %v213_v56 = vmul.f32 %v205_v51, %v205_v51 }
 0x20b   :  { %v214_v44 = vadd.f32 %v207_v41, %v206_v40  ;;  %v230_v2 = vmax.f32 %v198_v36, 0.0  ;;  %v231_v5 = vmax.f32 %v199_v37, 0.0  ;;  %v232_v6 = vmax.f32 %v200_v38, 0.0 }
 0x20c   :  { %v233_v7 = vmax.f32 %v201_v39, 0.0  ;;  %v234_v8 = vmax.f32 %v202_v42, 0.0  ;;  %v235_v9 = vmax.f32 %v203_v45, 0.0  ;;  %v236_v10 = vmax.f32 %v204_v48, 0.0 }
 0x20d   :  { %v215_v47 = vadd.f32 %v214_v44, %v208_v43  ;;  %v237_v11 = vmax.f32 %v205_v51, 0.0 }
 0x20f   :  { %v216_v50 = vadd.f32 %v215_v47, %v209_v46 }
 0x211   :  { %v217_v53 = vadd.f32 %v216_v50, %v210_v49 }
 0x213   :  { %v218_v55 = vadd.f32 %v217_v53, %v211_v52 }
 0x215   :  { %v219_v57 = vadd.f32 %v218_v55, %v212_v54 }
 0x217   :  { %v220_v58 = vadd.f32 %v219_v57, %v213_v56 }
 0x219   :  { %221 = vadd.xlane.f32.xlu1 %v220_v58 }
 0x2a2   :  { %v222_v59 = vpop.xlane.xlu1 %221 }
 0x2a3   :  { %v223_v60 = vmul.f32 0.0009775171, %v222_v59 }
 0x2a5   :  { %v224_v61 = vadd.f32 1e-08, %v223_v60 }
 0x2a7   :  { %404 = vrcp.f32 %v224_v61 }
 0x2b4   :  { %v405_v62 = vpop.eup %404 }
 0x2b5   :  { %v226_v63 = vmul.f32 %v405_v62, %v224_v61 }
 0x2b7   :  { %v227_v0 = vsub.f32 2.0, %v226_v63 }
 0x2b9   :  { %v228_v1 = vmul.f32 %v405_v62, %v227_v0 }
 0x2bb   :  { %v229_v4 = vmul.f32 1000.0, %v228_v1 }
 0x2bd   :  { %v238_v12 = vmul.f32 %v230_v2, %v229_v4  ;;  %v239_v13 = vmul.f32 %v231_v5, %v229_v4  ;;  %v240_v14 = vmul.f32 %v232_v6, %v229_v4  ;;  %v528_v15 = vmul.f32 %v233_v7, %v229_v4 }
 0x2be   :  { %v530_v16 = vmul.f32 %v234_v8, %v229_v4  ;;  %v532_v17 = vmul.f32 %v235_v9, %v229_v4  ;;  %v534_v18 = vmul.f32 %v236_v10, %v229_v4  ;;  %v536_v22 = vmul.f32 %v237_v11, %v229_v4 }
 0x2bf   :  { %v246_v24 = vand.u32 2147483647, %v238_v12  ;;  %v247_v26 = vand.u32 2147483647, %v239_v13  ;;  %v248_v28 = vand.u32 2147483647, %v240_v14 }
 0x2c0   :  { %v249_v30 = vand.u32 2147483647, %v528_v15  ;;  %v250_v32 = vand.u32 2147483647, %v530_v16  ;;  %v251_v33 = vand.u32 2147483647, %v532_v17 }
 0x2c1   :  { %v252_v35 = vand.u32 2147483647, %v534_v18  ;;  %v254_v36 = vadd.f32 1.0, %v246_v24  ;;  %v255_v37 = vadd.f32 1.0, %v247_v26  ;;  %v253_v38 = vand.u32 2147483647, %v536_v22 }
 0x2c2   :  { %v256_v39 = vadd.f32 1.0, %v248_v28  ;;  %v257_v40 = vadd.f32 1.0, %v249_v30  ;;  %v258_v41 = vadd.f32 1.0, %v250_v32  ;;  %v259_v42 = vadd.f32 1.0, %v251_v33 }
 0x2c3   :  { %406 = vrcp.f32 %v254_v36  ;;  %v260_v43 = vadd.f32 1.0, %v252_v35  ;;  %v261_v44 = vadd.f32 1.0, %v253_v38 }
 0x2c4   :  { %408 = vrcp.f32 %v255_v37 }
 0x2c5   :  { %410 = vrcp.f32 %v256_v39 }
 0x2c6   :  { %412 = vrcp.f32 %v257_v40 }
 0x2c7   :  { %414 = vrcp.f32 %v258_v41 }
 0x2c8   :  { %416 = vrcp.f32 %v259_v42 }
 0x2c9   :  { %418 = vrcp.f32 %v260_v43 }
 0x2ca   :  { %420 = vrcp.f32 %v261_v44 }
 0x2d0   :  { %v407_v45 = vpop.eup %406 }
 0x2d1   :  { %v409_v46 = vpop.eup %408  ;;  %v270_v47 = vmul.f32 %v407_v45, %v254_v36 }
 0x2d2   :  { %v411_v48 = vpop.eup %410  ;;  %v271_v49 = vmul.f32 %v409_v46, %v255_v37 }
 0x2d3   :  { %v413_v50 = vpop.eup %412  ;;  %v272_v51 = vmul.f32 %v411_v48, %v256_v39  ;;  %v278_v52 = vsub.f32 2.0, %v270_v47 }
 0x2d4   :  { %v415_v53 = vpop.eup %414  ;;  %v273_v54 = vmul.f32 %v413_v50, %v257_v40  ;;  %v279_v55 = vsub.f32 2.0, %v271_v49 }
 0x2d5   :  { %v417_v56 = vpop.eup %416  ;;  %v274_v57 = vmul.f32 %v415_v53, %v258_v41  ;;  %v280_v58 = vsub.f32 2.0, %v272_v51  ;;  %v286_v59 = vmul.f32 %v407_v45, %v278_v52 }
 0x2d6   :  { %v419_v60 = vpop.eup %418  ;;  %v275_v61 = vmul.f32 %v417_v56, %v259_v42  ;;  %v281_v62 = vsub.f32 2.0, %v273_v54  ;;  %v287_v63 = vmul.f32 %v409_v46, %v279_v55 }
 0x2d7   :  { %v421_v0 = vpop.eup %420  ;;  %v276_v1 = vmul.f32 %v419_v60, %v260_v43  ;;  %v282_v2 = vsub.f32 2.0, %v274_v57  ;;  %v288_v4 = vmul.f32 %v411_v48, %v280_v58  ;;  %v294_v5 = vmul.f32 %v286_v59, %v238_v12 }
 0x2d8   :  { %v277_v6 = vmul.f32 %v421_v0, %v261_v44  ;;  %v283_v7 = vsub.f32 2.0, %v275_v61  ;;  %v289_v8 = vmul.f32 %v413_v50, %v281_v62  ;;  %v295_v9 = vmul.f32 %v287_v63, %v239_v13 }
 0x2d9   :  { %v284_v10 = vsub.f32 2.0, %v276_v1  ;;  %v290_v11 = vmul.f32 %v415_v53, %v282_v2  ;;  %v296_v24 = vmul.f32 %v288_v4, %v240_v14  ;;  %v302_v26 = vmul.f32 %v294_v5, %v493_v19 }
 0x2da   :  { %v319_v28 = vadd.f32 %v295_v9, %v294_v5  ;;  %v285_v30 = vsub.f32 2.0, %v277_v6  ;;  %v291_v32 = vmul.f32 %v417_v56, %v283_v7  ;;  %v297_v33 = vmul.f32 %v289_v8, %v528_v15 }
 0x2db   :  { %v303_v35 = vmul.f32 %v295_v9, %v495_v20  ;;  %v292_v37 = vmul.f32 %v419_v60, %v284_v10  ;;  %v298_v12 = vmul.f32 %v290_v11, %v530_v16  ;;  %v304_v38 = vmul.f32 %v296_v24, %v497_v21 }
 0x2dc   :  { %v320_v36 = vadd.f32 %v319_v28, %v296_v24  ;;  %v293_v40 = vmul.f32 %v421_v0, %v285_v30  ;;  %v299_v14 = vmul.f32 %v291_v32, %v532_v17  ;;  %v305_v19 = vmul.f32 %v297_v33, %v501_v23 }
 0x2dd   :  { %v310_v39 = vadd.f32 %v303_v35, %v302_v26  ;;  %v300_v43 = vmul.f32 %v292_v37, %v534_v18  ;;  %v306_v15 = vmul.f32 %v298_v12, %v504_v25 }
 0x2de   :  { %v321_v13 = vadd.f32 %v320_v36, %v297_v33  ;;  %v301_v45 = vmul.f32 %v293_v40, %v536_v22  ;;  %v307_v16 = vmul.f32 %v299_v14, %v507_v27 }
 0x2df   :  { %v311_v41 = vadd.f32 %v310_v39, %v304_v38  ;;  %v308_v47 = vmul.f32 %v300_v43, %v510_v29 }
 0x2e0   :  { %v322_v42 = vadd.f32 %v321_v13, %v298_v12  ;;  %v309_v23 = vmul.f32 %v301_v45, %v513_v31 }
 0x2e1   :  { %v312_v20 = vadd.f32 %v311_v41, %v305_v19 }
 0x2e2   :  { %v323_v44 = vadd.f32 %v322_v42, %v299_v14 }
 0x2e3   :  { %v313_v21 = vadd.f32 %v312_v20, %v306_v15 }
 0x2e4   :  { %v324_v46 = vadd.f32 %v323_v44, %v300_v43 }
 0x2e5   :  { %v314_v48 = vadd.f32 %v313_v21, %v307_v16 }
 0x2e6   :  { %v325_v17 = vadd.f32 %v324_v46, %v301_v45 }
 0x2e7   :  { %v315_v49 = vadd.f32 %v314_v48, %v308_v47 }
 0x2e8   :  { %326 = vadd.xlane.f32.xlu0 %v325_v17 }
 0x2e9   :  { %v316_v50 = vadd.f32 %v315_v49, %v309_v23 }
 0x2eb   :  { %317 = vadd.xlane.f32.xlu1 %v316_v50 }
 0x371   :  { %v327_v18 = vpop.xlane.xlu0 %326 }
 0x372   :  { %v329_v25 = vmul.f32 0.0009765625, %v327_v18 }
 0x374   :  { %v330_v51 = vsub.f32 1.0, %v329_v25  ;;  %v318_v52 = vpop.xlane.xlu1 %317 }
 0x375   :  { %v328_v22 = vsub.f32 %v517_v34, %v318_v52 }
 0x376   :  { %v344_v53 = vmax.f32 %v329_v25, %v330_v51 }
 0x377   :  { %v331_v27 = vmax.f32 %v318_v52, %v328_v22 }
 0x378   :  { %v345_v54 = vsub.f32 %v329_v25, %v344_v53  ;;  %v348_v55 = vsub.f32 %v330_v51, %v344_v53 }
 0x379   :  { %v332_v56 = vsub.f32 %v318_v52, %v331_v27  ;;  %v335_v29 = vsub.f32 %v328_v22, %v331_v27 }
 0x37a   :  { %v346_v57 = vmul.f32 1.442695, %v345_v54  ;;  %v349_v58 = vmul.f32 1.442695, %v348_v55 }
 0x37b   :  { %v333_v59 = vmul.f32 1.442695, %v332_v56  ;;  %v336_v31 = vmul.f32 1.442695, %v335_v29 }
 0x37c   :  { %422 = vpow2.f32 %v346_v57 }
 0x37d   :  { %424 = vpow2.f32 %v349_v58 }
 0x37e   :  { %426 = vpow2.f32 %v333_v59 }
 0x37f   :  { %428 = vpow2.f32 %v336_v31 }
 0x389   :  { %v423_v60 = vpop.eup %422 }
 0x38a   :  { %v425_v61 = vpop.eup %424 }
 0x38b   :  { %v427_v62 = vpop.eup %426  ;;  %v351_v63 = vadd.f32 %v425_v61, %v423_v60 }
 0x38c   :  { %v429_v0 = vpop.eup %428 }
 0x38d   :  { %430 = vrcp.f32 %v351_v63  ;;  %v338_v34 = vadd.f32 %v429_v0, %v427_v62 }
 0x38f   :  { %432 = vlog2.f32 %v338_v34 }
 0x39a   :  { %v431_v1 = vpop.eup %430 }
 0x39b   :  { %v353_v2 = vmul.f32 %v431_v1, %v351_v63 }
 0x39c   :  { %v433_v4 = vpop.eup %432 }
 0x39d   :  { %v354_v5 = vsub.f32 2.0, %v353_v2  ;;  %v340_v6 = vmul.f32 0.6931472, %v433_v4 }
 0x39f   :  { %v355_v7 = vmul.f32 %v431_v1, %v354_v5  ;;  %v341_v8 = vadd.f32 %v340_v6, %v331_v27 }
 0x3a1   :  { %v356_v9 = vmul.f32 %v423_v60, %v355_v7  ;;  %v357_v10 = vmul.f32 %v425_v61, %v355_v7  ;;  %v342_v11 = vsub.f32 %v318_v52, %v341_v8  ;;  %v343_v24 = vsub.f32 %v328_v22, %v341_v8 }
 0x3a3   :  { %v358_v26 = vmul.f32 %v356_v9, %v342_v11  ;;  %v359_v28 = vmul.f32 %v357_v10, %v343_v24 }
 0x3a5   :  { %v360_v30 = vadd.f32 %v359_v28, %v358_v26 }
 0x3a7   :  { %v361_v32 = vsub.f32 0.0, %v360_v30 }
 0x3a9   :  { %v362_v33 = vsel %vm35_vm0, %v361_v32, 0.0 }
 0x3aa   :  { %364 = vst.msk [vmem:[%s563_s1] sm:$0xff] %vm363_vm1, %v362_v33 }
 0x3ab   :  { %369 = vsyncpa [#allocation3], 1 }

</bundles_post_ra>
